<compile_context>
chip_gen: v6e
topology: v6e:2x2x1
jax: 0.10.0
libtpu: 0.0.40
codegen_flags: <defaults>
</compile_context>

<pallas_src>
import functools
import math

import numpy as np

import jax
import jax.numpy as jnp
from jax import lax
from jax.experimental import pallas as pl
from jax.experimental.pallas import tpu as pltpu

_BN_EPS = 1e-5
_NEG_BIG = -3.0e38                       # "-inf" padding value for max-pool
_VMEM_LIMIT_BYTES = 48 * 1024 * 1024     # explicit scoped-VMEM budget (fits v7x 64 MiB)
_TILE_VMEM_BUDGET = 20 * 1024 * 1024     # target per-grid-step working set
_LIVE_F32_COPIES = 16                    # rough count of live tile-sized f32 buffers


# ---------------------------------------------------------------------------
# Small helpers
# ---------------------------------------------------------------------------
def _tap_offsets(K):
    p = K // 2
    return [(kh - p, kw - p) for kh in range(K) for kw in range(K)]


def _round_up(x, m):
    return -(-x // m) * m


_ROLL_SIGN_CACHE = []


def _roll_sign():
    """+1 if pltpu.roll follows jnp.roll convention (result[i] = x[i - shift]),
    -1 otherwise.  Pinned once with a tiny probe kernel (runs eagerly); asserts
    the probe hit one of the two expected conventions."""
    if not _ROLL_SIGN_CACHE:
        def probe(x_ref, o_ref):
            o_ref[...] = pltpu.roll(x_ref[...], 1, 1)

        xs = jnp.tile(jnp.arange(128, dtype=jnp.float32), (8, 1))
        out = pl.pallas_call(
            probe, out_shape=jax.ShapeDtypeStruct((8, 128), jnp.float32))(xs)
        v = float(out[0, 0])
        assert v in (127.0, 1.0), f"unexpected pltpu.roll convention probe: {v}"
        _ROLL_SIGN_CACHE.append(1 if v == 127.0 else -1)
    return _ROLL_SIGN_CACHE[0]


def _lane_shift(x, d, sign):
    """out[:, l] = x[:, l + d] for every lane whose source stays in range; the
    zero/-inf borders of the assembled buffer guarantee that wrapped lanes are
    never read by interior positions.  One XLU rotate, no masks."""
    if d == 0:
        return x
    L = x.shape[-1]
    return pltpu.roll(x, (-sign * d) % L, axis=1)


# ---------------------------------------------------------------------------
# Tiling plan + cached per-tile constants
# ---------------------------------------------------------------------------
def _plan_tiles(H, W, C, halo_rows):
    """Pick (tile_h, halo_blk, h_pad, n_tiles) so every block's flattened spatial
    length is a multiple of 128 lanes (lane-dense, unmasked stores) and the
    per-step working set stays within _TILE_VMEM_BUDGET.  Prefers >= 2 H-tiles
    so v7x's two TensorCores get work even at batch 1-2."""
    g = 128 // math.gcd(W, 128)                   # min rows with rows*W % 128 == 0
    halo_blk = g * max(1, -(-halo_rows // g))     # halo block rows (>= halo_rows)
    per_row = C * (W + 2 * max(halo_rows, 1)) * 4 * _LIVE_F32_COPIES
    cap = (_TILE_VMEM_BUDGET // per_row) // halo_blk * halo_blk
    pref = (max(H // 2, halo_blk) // halo_blk) * halo_blk
    tile_h = min(cap, pref)
    if tile_h < halo_blk or halo_blk > H:
        # TODO(synk): odd W (e.g. 129) cannot be row-tiled lane-densely under the
        # (8,128) block rule; fall back to a single full-extent tile per image.
        return H, H, H, 1
    h_pad = _round_up(H, tile_h)
    return tile_h, halo_blk, h_pad, h_pad // tile_h


@functools.lru_cache(maxsize=None)
def _interior_mask(H, W, tile_h, halo_rows, col_pad, n_tiles, total_len):
    """(n_tiles, 1, total_len) f32: 1 where a padded-tile position maps to a real
    (h, w) inside the original HxW image, else 0.  Tiny; cached per config."""
    rows_b = tile_h + 2 * halo_rows
    wb = W + 2 * col_pad
    m = np.zeros((n_tiles, 1, total_len), np.float32)
    for t in range(n_tiles):
        for j in range(rows_b):
            grow = t * tile_h - halo_rows + j
            if 0 <= grow < H:
                m[t, 0, j * wb + col_pad: j * wb + col_pad + W] = 1.0
    return jnp.asarray(m)


# ---------------------------------------------------------------------------
# In-kernel helpers
# ---------------------------------------------------------------------------
def _assemble_tile(buf_ref, up_ref, cen_ref, dn_ref, t, n_tiles, tile_h,
                   halo_blk, W, halo_rows, col_pad, fill):
    """Gather halo rows + tile rows into a `fill`-bordered flattened VMEM scratch
    laid out as (C, (tile_h + 2*halo_rows)*(W + 2*col_pad)) (tail-padded to a
    128-lane multiple).  After this every conv/pool tap is roll + accumulate."""
    rows_b = tile_h + 2 * halo_rows
    wb = W + 2 * col_pad
    buf_ref[...] = jnp.full(buf_ref.shape, fill, jnp.float32)
    for j in range(rows_b):
        if j < halo_rows:                      # rows above the tile
            src_j = halo_blk - halo_rows + j
            src = up_ref[0, :, src_j * W:(src_j + 1) * W]
            row = jnp.where(t > 0, src, fill)
        elif j < halo_rows + tile_h:           # the tile itself
            src_j = j - halo_rows
            row = cen_ref[0, :, src_j * W:(src_j + 1) * W]
        else:                                  # rows below the tile
            src_j = j - halo_rows - tile_h
            src = dn_ref[0, :, src_j * W:(src_j + 1) * W]
            row = jnp.where(t < n_tiles - 1, src, fill)
        buf_ref[:, j * wb + col_pad: j * wb + col_pad + W] = row
    return buf_ref[...]


# ---------------------------------------------------------------------------
# Pallas kernels (grid = (N, n_h_tiles); blocks are (1, C, tile_h*W))
# ---------------------------------------------------------------------------
def _sepconv_kernel(K, H, W, tile_h, halo_blk, fold, add_res, sign, *refs):
    """Fused (ReLU -> dw KxK -> pw 1x1 -> WSBN) x 2, optional '+ residual'."""
    p = K // 2
    halo = 2 * p                       # two stacked KxK convs need 2*p halo rows
    wb = W + 2 * p
    refs = list(refs)
    buf_ref = refs.pop()               # VMEM scratch
    o_ref = refs.pop()
    res_ref = refs.pop() if add_res else None
    up_ref, cen_ref, dn_ref, mask_ref = refs[:4]
    wrefs = refs[4:]

    t = pl.program_id(1)
    n_tiles = pl.num_programs(1)
    C = cen_ref.shape[1]
    Lb = buf_ref.shape[1]
    taps = _tap_offsets(K)

    x_pad = _assemble_tile(buf_ref, up_ref, cen_ref, dn_ref, t, n_tiles, tile_h,
                           halo_blk, W, halo, p, 0.0)
    a1 = jnp.maximum(x_pad, 0.0)                  # ReLU; zero border stays zero
    mask = mask_ref[0]                            # (1, Lb) image-interior mask

    def half(a, w):
        acc = jnp.zeros((C, Lb), jnp.float32)
        if fold:
            wf_ref, sc_ref, sh_ref = w
            for ti, (dh, dw) in enumerate(taps):
                s = _lane_shift(a, dh * wb + dw, sign)       # XLU roll
                acc = acc + jnp.dot(wf_ref[ti], s,           # dw∘pw fused, on the MXU
                                    preferred_element_type=jnp.float32)
            h = acc
        else:
            wdw_ref, wpw_ref, sc_ref, sh_ref = w
            wdw = wdw_ref[...]                               # hoisted out of loop
            for ti, (dh, dw) in enumerate(taps):
                s = _lane_shift(a, dh * wb + dw, sign)
                acc = acc + s * wdw[:, ti:ti + 1]            # roll + 1 mul + add
            h = jnp.dot(wpw_ref[...], acc.astype(jnp.bfloat16),
                        preferred_element_type=jnp.float32)  # pw 1x1 on the MXU
        return h * sc_ref[...] + sh_ref[...]                 # folded inference WSBN

    if fold:
        w1, w2 = tuple(wrefs[:3]), tuple(wrefs[3:])
    else:
        w1, w2 = tuple(wrefs[:4]), tuple(wrefs[4:])
    h1 = half(a1, w1)
    a2 = jnp.maximum(h1, 0.0) * mask   # ReLU; re-impose zero padding outside image
    h2 = half(a2, w2)

    for r in range(tile_h):            # interior rows -> lane-dense output block
        row = h2[:, (halo + r) * wb + p:(halo + r) * wb + p + W]
        if res_ref is not None:
            row = row + res_ref[0, :, r * W:(r + 1) * W]     # fused branch add
        o_ref[0, :, r * W:(r + 1) * W] = row.astype(o_ref.dtype)


def _avgpool3_kernel(H, W, tile_h, halo_blk, add_res, sign, *refs):
    """3x3 avg pool, stride 1, pad 1, count_include_pad=False (+ residual)."""
    wb = W + 2
    refs = list(refs)
    buf_ref = refs.pop()
    o_ref = refs.pop()
    res_ref = refs.pop() if add_res else None
    up_ref, cen_ref, dn_ref = refs

    t = pl.program_id(1)
    n_tiles = pl.num_programs(1)
    C = cen_ref.shape[1]
    Lb = buf_ref.shape[1]

    buf = _assemble_tile(buf_ref, up_ref, cen_ref, dn_ref, t, n_tiles, tile_h,
                         halo_blk, W, 1, 1, 0.0)
    acc = jnp.zeros((C, Lb), jnp.float32)
    for dh, dw in _tap_offsets(3):
        acc = acc + _lane_shift(buf, dh * wb + dw, sign)     # roll + add per tap

    # exact per-position valid-tap count (count_include_pad=False)
    ocol = lax.broadcasted_iota(jnp.int32, (1, W), 1)
    ccnt = 3 - (ocol == 0).astype(jnp.int32) - (ocol == W - 1).astype(jnp.int32)
    for r in range(tile_h):
        gr = t * tile_h + r
        rcnt = 3 - jnp.where(gr == 0, 1, 0) - jnp.where(gr == H - 1, 1, 0)
        cnt = (rcnt * ccnt).astype(jnp.float32)              # (1, W)
        row = acc[:, (1 + r) * wb + 1:(1 + r) * wb + 1 + W] / cnt
        if res_ref is not None:
            row = row + res_ref[0, :, r * W:(r + 1) * W]
        o_ref[0, :, r * W:(r + 1) * W] = row.astype(o_ref.dtype)


def _maxpool3_kernel(H, W, tile_h, halo_blk, use_mask, add_res, sign, *refs):
    """3x3 max pool, stride 1, pad 1 (-inf padding via buffer fill) (+ residual)."""
    wb = W + 2
    refs = list(refs)
    buf_ref = refs.pop()
    o_ref = refs.pop()
    res_ref = refs.pop() if add_res else None
    if use_mask:
        up_ref, cen_ref, dn_ref, mask_ref = refs
    else:
        up_ref, cen_ref, dn_ref = refs
        mask_ref = None

    t = pl.program_id(1)
    n_tiles = pl.num_programs(1)

    buf = _assemble_tile(buf_ref, up_ref, cen_ref, dn_ref, t, n_tiles, tile_h,
                         halo_blk, W, 1, 1, _NEG_BIG)
    if use_mask:     # rows past the original H were zero-padded in HBM -> -inf them
        buf = jnp.where(mask_ref[0] > 0.0, buf, _NEG_BIG)

    out = None
    for dh, dw in _tap_offsets(3):
        s = _lane_shift(buf, dh * wb + dw, sign)
        out = s if out is None else jnp.maximum(out, s)      # roll + max per tap

    for r in range(tile_h):
        row = out[:, (1 + r) * wb + 1:(1 + r) * wb + 1 + W]
        if res_ref is not None:
            row = row + res_ref[0, :, r * W:(r + 1) * W]
        o_ref[0, :, r * W:(r + 1) * W] = row.astype(o_ref.dtype)


def _add_kernel(x_ref, y_ref, o_ref):
    o_ref[...] = x_ref[...] + y_ref[...]


# ---------------------------------------------------------------------------
# pallas_call plumbing
# ---------------------------------------------------------------------------
def _const_spec(shape):
    nd = len(shape)
    return pl.BlockSpec(shape, lambda n, t, _nd=nd: (0,) * _nd)


def _run_spatial_op(kernel, x_ncl, consts, residual, H, W,
                    tile_h, halo_blk, h_pad, n_tiles, scratch_shapes):
    N, C, L = x_ncl.shape
    pad = h_pad * W - L
    xp = x_ncl if pad == 0 else jnp.pad(x_ncl, ((0, 0), (0, 0), (0, pad)))
    r = tile_h // halo_blk
    n_hb = h_pad // halo_blk
    cen_spec = pl.BlockSpec((1, C, tile_h * W), lambda n, t: (n, 0, t))
    up_spec = pl.BlockSpec((1, C, halo_blk * W),
                           lambda n, t: (n, 0, jnp.maximum(t * r - 1, 0)))
    dn_spec = pl.BlockSpec((1, C, halo_blk * W),
                           lambda n, t: (n, 0, jnp.minimum((t + 1) * r, n_hb - 1)))
    inputs = [xp, xp, xp] + [c for c, _ in consts]
    specs = [up_spec, cen_spec, dn_spec] + [s for _, s in consts]
    if residual is not None:
        rp = residual if pad == 0 else jnp.pad(residual, ((0, 0), (0, 0), (0, pad)))
        inputs.append(rp)
        specs.append(cen_spec)
    out = pl.pallas_call(
        kernel,
        out_shape=jax.ShapeDtypeStruct((N, C, h_pad * W), jnp.float32),
        grid=(N, n_tiles),
        in_specs=specs,
        out_specs=cen_spec,
        scratch_shapes=scratch_shapes,
        compiler_params=pltpu.CompilerParams(
            dimension_semantics=("parallel", "parallel"),
            vmem_limit_bytes=_VMEM_LIMIT_BYTES),
    )(*inputs)
    return out if pad == 0 else out[:, :, :L]


def _pcall_add(a, b, H, W):
    N, C, L = a.shape
    tile_h, _, h_pad, n_tiles = _plan_tiles(H, W, C, 1)
    pad = h_pad * W - L
    ap = a if pad == 0 else jnp.pad(a, ((0, 0), (0, 0), (0, pad)))
    bp = b if pad == 0 else jnp.pad(b, ((0, 0), (0, 0), (0, pad)))
    spec = pl.BlockSpec((1, C, tile_h * W), lambda n, t: (n, 0, t))
    out = pl.pallas_call(
        _add_kernel,
        out_shape=jax.ShapeDtypeStruct((N, C, h_pad * W), jnp.float32),
        grid=(N, n_tiles),
        in_specs=[spec, spec],
        out_specs=spec,
        compiler_params=pltpu.CompilerParams(
            dimension_semantics=("parallel", "parallel"),
            vmem_limit_bytes=_VMEM_LIMIT_BYTES),
    )(ap, bp)
    return out if pad == 0 else out[:, :, :L]


# ---------------------------------------------------------------------------
# Weight-shared ops (one parameter set per possible input id)
# ---------------------------------------------------------------------------
class WSSepConv:
    """Weight-shared separable conv: (ReLU -> dw KxK -> pw 1x1 -> WSBN) x 2 in a
    single pallas_call; `residual` is added in the kernel epilogue."""

    def __init__(self, num_possible_inputs, C_in, C_out, kernel_size, key,
                 use_mxu_fold=None):
        assert C_in == C_out
        self.k = kernel_size
        C = C_in
        kk = kernel_size * kernel_size
        ks = jax.random.split(key, 8)
        init = lambda k_, shape: 0.1 * jax.random.normal(k_, shape, jnp.float32)
        # depthwise taps, channel-major (C, K*K), tap index t = kh*K + kw
        self.w1_dw = init(ks[0], (num_possible_inputs, C, kk))
        self.w2_dw = init(ks[4], (num_possible_inputs, C, kk))
        # pointwise, PyTorch OI layout (C_out, C_in)
        self.w1_pw = init(ks[1], (num_possible_inputs, C, C))
        self.w2_pw = init(ks[5], (num_possible_inputs, C, C))
        self.g1 = 1.0 + init(ks[2], (num_possible_inputs, C))
        self.b1 = init(ks[3], (num_possible_inputs, C))
        self.g2 = 1.0 + init(ks[6], (num_possible_inputs, C))
        self.b2 = init(ks[7], (num_possible_inputs, C))
        # inference-mode WSBN folded once (running_mean=0, running_var=1)
        bn = 1.0 / np.sqrt(1.0 + _BN_EPS)
        self.sc1 = self.g1 * bn
        self.sc2 = self.g2 * bn
        # Small (search-width) C: fold dw taps into per-tap pointwise matrices so
        # the whole tap loop runs on the otherwise-idle MXU.  Large C would flip
        # the kernel MXU-bound, so keep the VPU + single bf16 pw matmul path.
        self.fold = (C <= 64) if use_mxu_fold is None else use_mxu_fold
        if self.fold:
            self.w1_fold = jnp.einsum('noi,nit->ntoi', self.w1_pw, self.w1_dw)
            self.w2_fold = jnp.einsum('noi,nit->ntoi', self.w2_pw, self.w2_dw)
        else:
            self.w1_pw_bf = self.w1_pw.astype(jnp.bfloat16)
            self.w2_pw_bf = self.w2_pw.astype(jnp.bfloat16)

    def __call__(self, x_ncl, x_id, H, W, residual=None):
        N, C, L = x_ncl.shape
        K = self.k
        p = K // 2
        kk = K * K
        tile_h, halo_blk, h_pad, n_tiles = _plan_tiles(H, W, C, 2 * p)
        lbp = _round_up((tile_h + 4 * p) * (W + 2 * p), 128)
        mask = _interior_mask(H, W, tile_h, 2 * p, p, n_tiles, lbp)
        consts = [(mask, pl.BlockSpec((1, 1, lbp), lambda n, t: (t, 0, 0)))]
        if self.fold:
            consts += [
                (self.w1_fold[x_id], _const_spec((kk, C, C))),
                (self.sc1[x_id].reshape(C, 1), _const_spec((C, 1))),
                (self.b1[x_id].reshape(C, 1), _const_spec((C, 1))),
                (self.w2_fold[x_id], _const_spec((kk, C, C))),
                (self.sc2[x_id].reshape(C, 1), _const_spec((C, 1))),
                (self.b2[x_id].reshape(C, 1), _const_spec((C, 1))),
            ]
        else:
            consts += [
                (self.w1_dw[x_id], _const_spec((C, kk))),
                (self.w1_pw_bf[x_id], _const_spec((C, C))),
                (self.sc1[x_id].reshape(C, 1), _const_spec((C, 1))),
                (self.b1[x_id].reshape(C, 1), _const_spec((C, 1))),
                (self.w2_dw[x_id], _const_spec((C, kk))),
                (self.w2_pw_bf[x_id], _const_spec((C, C))),
                (self.sc2[x_id].reshape(C, 1), _const_spec((C, 1))),
                (self.b2[x_id].reshape(C, 1), _const_spec((C, 1))),
            ]
        kernel = functools.partial(_sepconv_kernel, K, H, W, tile_h, halo_blk,
                                   self.fold, residual is not None, _roll_sign())
        return _run_spatial_op(kernel, x_ncl, consts, residual, H, W,
                               tile_h, halo_blk, h_pad, n_tiles,
                               [pltpu.VMEM((C, lbp), jnp.float32)])


class WSAvgPool3x3:
    def __call__(self, x_ncl, x_id, H, W, residual=None):
        del x_id
        N, C, L = x_ncl.shape
        tile_h, halo_blk, h_pad, n_tiles = _plan_tiles(H, W, C, 1)
        lbp = _round_up((tile_h + 2) * (W + 2), 128)
        kernel = functools.partial(_avgpool3_kernel, H, W, tile_h, halo_blk,
                                   residual is not None, _roll_sign())
        return _run_spatial_op(kernel, x_ncl, [], residual, H, W,
                               tile_h, halo_blk, h_pad, n_tiles,
                               [pltpu.VMEM((C, lbp), jnp.float32)])


class WSMaxPool3x3:
    def __call__(self, x_ncl, x_id, H, W, residual=None):
        del x_id
        N, C, L = x_ncl.shape
        tile_h, halo_blk, h_pad, n_tiles = _plan_tiles(H, W, C, 1)
        lbp = _round_up((tile_h + 2) * (W + 2), 128)
        use_mask = (h_pad != H)        # only when H was padded up to the tile grid
        consts = []
        if use_mask:
            mask = _interior_mask(H, W, tile_h, 1, 1, n_tiles, lbp)
            consts.append((mask, pl.BlockSpec((1, 1, lbp), lambda n, t: (t, 0, 0))))
        kernel = functools.partial(_maxpool3_kernel, H, W, tile_h, halo_blk,
                                   use_mask, residual is not None, _roll_sign())
        return _run_spatial_op(kernel, x_ncl, consts, residual, H, W,
                               tile_h, halo_blk, h_pad, n_tiles,
                               [pltpu.VMEM((C, lbp), jnp.float32)])


class WSIdentity:
    def __call__(self, x_ncl, x_id, H, W, residual=None):
        del x_id  # stride forced to 1 by Node.forward
        return x_ncl if residual is None else x_ncl + residual


# ---------------------------------------------------------------------------
# Node
# ---------------------------------------------------------------------------
class Node:
    """out = x_op[x_op_idx](x, x_id) + y_op[y_op_idx](y, y_id), stride = 1.

    Op set (OPERATIONS_search_without_mor):
      0: sep_conv_3x3  1: sep_conv_5x5  2: avg_pool_3x3  3: max_pool_3x3  4: identity
    """

    def __init__(self, search_space, channels, stride, node_id, key,
                 drop_path_keep_prob=None, sepconv_mxu_fold=None):
        # TODO(synk): 'with_mor_ops' adds morphological ops whose definitions are
        # not in the provided snippet; only the standard NAO op set is built.
        del drop_path_keep_prob
        self.search_space = search_space
        self.channels = channels
        self.stride = stride
        self.node_id = node_id
        num_possible_inputs = node_id + 2
        kx, ky = jax.random.split(key)

        def build(kbase):
            k3, k5 = jax.random.split(kbase)
            return [
                WSSepConv(num_possible_inputs, channels, channels, 3, k3,
                          sepconv_mxu_fold),
                WSSepConv(num_possible_inputs, channels, channels, 5, k5,
                          sepconv_mxu_fold),
                WSAvgPool3x3(),
                WSMaxPool3x3(),
                WSIdentity(),
            ]

        self.x_op = build(kx)
        self.y_op = build(ky)

    def forward(self, x, x_id, x_op, y, y_id, y_op, bn_train=False):
        del bn_train  # WSBN folded in inference mode (see module docstring).
        N, C, H, W = x.shape
        L = H * W
        xf = x.reshape(N, C, L)   # flattened NCHW; no transposes anywhere
        yf = y.reshape(N, C, L)
        x_is_id = isinstance(self.x_op[x_op], WSIdentity)
        y_is_id = isinstance(self.y_op[y_op], WSIdentity)
        if not x_is_id:
            yo = yf if y_is_id else self.y_op[y_op](yf, y_id, H, W)
            out = self.x_op[x_op](xf, x_id, H, W, residual=yo)
        elif not y_is_id:
            out = self.y_op[y_op](yf, y_id, H, W, residual=xf)
        else:
            out = _pcall_add(xf, yf, H, W)
        return out.reshape(N, C, H, W)


# ---------------------------------------------------------------------------
# Pure-JAX reference (NCHW, mirrors the PyTorch semantics) for validation
# ---------------------------------------------------------------------------
def _ref_sepconv(x, op, x_id):
    K = op.k
    p = K // 2
    C = x.shape[1]

    def half(h, w_dw, w_pw, g, b):
        h = jnp.maximum(h, 0.0)
        wd = w_dw.reshape(C, K, K)[:, None, :, :]
        h = lax.conv_general_dilated(h, wd, (1, 1), [(p, p), (p, p)],
                                     feature_group_count=C,
                                     dimension_numbers=("NCHW", "OIHW", "NCHW"))
        wp = w_pw[:, :, None, None]
        h = lax.conv_general_dilated(h, wp, (1, 1), [(0, 0), (0, 0)],
                                     dimension_numbers=("NCHW", "OIHW", "NCHW"))
        scale = g / jnp.sqrt(1.0 + _BN_EPS)
        return h * scale[None, :, None, None] + b[None, :, None, None]

    h = half(x, op.w1_dw[x_id], op.w1_pw[x_id], op.g1[x_id], op.b1[x_id])
    h = half(h, op.w2_dw[x_id], op.w2_pw[x_id], op.g2[x_id], op.b2[x_id])
    return h


def _ref_avgpool(x):
    win, s = (1, 1, 3, 3), (1, 1, 1, 1)
    pad = [(0, 0), (0, 0), (1, 1), (1, 1)]
    tot = lax.reduce_window(x, 0.0, lax.add, win, s, pad)
    cnt = lax.reduce_window(jnp.ones_like(x), 0.0, lax.add, win, s, pad)
    return tot / cnt


def _ref_maxpool(x):
    win, s = (1, 1, 3, 3), (1, 1, 1, 1)
    pad = [(0, 0), (0, 0), (1, 1), (1, 1)]
    return lax.reduce_window(x, -jnp.inf, lax.max, win, s, pad)


def _ref_apply(op_idx, op, x, x_id):
    if op_idx in (0, 1):
        return _ref_sepconv(x, op, x_id)
    if op_idx == 2:
        return _ref_avgpool(x)
    if op_idx == 3:
        return _ref_maxpool(x)
    return x


def node_forward_ref(node, x, x_id, x_op, y, y_id, y_op):
    return (_ref_apply(x_op, node.x_op[x_op], x, x_id)
            + _ref_apply(y_op, node.y_op[y_op], y, y_id))


# ---------------------------------------------------------------------------
if __name__ == "__main__":
    key = jax.random.PRNGKey(0)
    k_node, k_node2, k_x, k_y, k_x2, k_y2 = jax.random.split(key, 6)

    N, C, H, W = 2, 32, 16, 16
    node = Node("without_mor_ops", channels=C, stride=1, node_id=1, key=k_node)
    node_nofold = Node("without_mor_ops", channels=C, stride=1, node_id=1,
                       key=k_node2, sepconv_mxu_fold=False)

    x = jax.random.normal(k_x, (N, C, H, W), jnp.float32)   # NCHW, like PyTorch
    y = jax.random.normal(k_y, (N, C, H, W), jnp.float32)
    x2 = jax.random.normal(k_x2, (N, C, 12, W), jnp.float32)  # H % tile_h != 0 path
    y2 = jax.random.normal(k_y2, (N, C, 12, W), jnp.float32)

    cases = [
        # (node, x, y, x_id, x_op, y_id, y_op, tol)
        (node, x, y, 1, 0, 0, 2, 1e-2),        # sep_conv_3x3 (MXU-folded) + avg_pool_3x3
        (node, x, y, 2, 1, 1, 4, 1e-2),        # sep_conv_5x5 + identity (fused add)
        (node, x, y, 0, 3, 2, 2, 1e-4),        # max_pool_3x3 + avg_pool_3x3
        (node, x, y, 0, 4, 1, 1, 1e-2),        # identity + sep_conv_5x5 (fused add)
        (node, x, y, 2, 4, 0, 4, 1e-5),        # identity + identity (tiled add)
        (node, x2, y2, 1, 1, 0, 3, 1e-2),      # sep_conv_5x5 + max_pool_3x3, H=12 (padded tiles)
        (node_nofold, x, y, 1, 0, 0, 4, 5e-2),  # sep_conv_3x3, VPU/bf16 path + identity
    ]
    for nd, xa, ya, x_id, x_opi, y_id, y_opi, tol in cases:
        out = jax.block_until_ready(nd.forward(xa, x_id, x_opi, ya, y_id, y_opi))
        ref = node_forward_ref(nd, xa, x_id, x_opi, ya, y_id, y_opi)
        assert out.shape == xa.shape
        err = float(jnp.max(jnp.abs(out - ref)))
        assert jnp.allclose(out, ref, atol=tol, rtol=tol), (
            f"mismatch for case {(x_id, x_opi, y_id, y_opi)}: max abs err {err}")

    print("KERNEL_OK")
</pallas_src>

<mosaic_0001>
module attributes {stable_mosaic.version = 11 : i64} {
  func.func @probe(%arg0: memref<8x128xf32, #tpu.memory_space<vmem>>, %arg1: memref<8x128xf32, #tpu.memory_space<vmem>>) attributes {dimension_semantics = [], scalar_prefetch = 0 : i64, scratch_operands = 0 : i64, tpu.core_type = #tpu.core_type<tc>} {
    %c0 = arith.constant 0 : index
    %c0_0 = arith.constant 0 : index
    %0 = vector.load %arg0[%c0, %c0_0] : memref<8x128xf32, #tpu.memory_space<vmem>>, vector<8x128xf32>
    %c1_i32 = arith.constant 1 : i32
    %1 = tpu.dynamic_rotate %0 by %c1_i32 dim 1 : vector<8x128xf32>, i32 -> vector<8x128xf32>
    %c0_1 = arith.constant 0 : index
    %c0_2 = arith.constant 0 : index
    %2 = vector.load %arg1[%c0_1, %c0_2] : memref<8x128xf32, #tpu.memory_space<vmem>>, vector<8x128xf32>
    tpu.vector_store %arg1[%c0_1, %c0_2], %1 {strides = array<i32>} : memref<8x128xf32, #tpu.memory_space<vmem>>, vector<8x128xf32>,
    return
  }
}

</mosaic_0001>

<bundles_post_ra>
// kernel: tpu_custom_call.1
= control target key start
LH: loop header
LB: loop body
LE: loop exit
PB: predicated region body
PF: predicated region fallthrough
CT: control target
= control target key end

     0   :  { %6 = vsyncpa [#allocation3], 0  ;;  %s106_s0 = inlined_call_operand.hbm [shape: f32[8,128], index: 0, kind: input, shape index: {}]   ;;  %s107_s1 = inlined_call_operand.hbm [shape: f32[8,128], index: 1, kind: output, shape index: {}]  }
   0x1   :  { %7 = vsyncpa [#allocation4], 0  ;;  %s87_s6 = smov [#allocation2]  }
   0x2   :  { %s14_s7 = sshll.u32 %s87_s6, 4  ;;  %s15_s7 = int_to_ptr.vmem [resolvable:$true] %s14_s7 }
   0x3   :  { %s51_s8 = scalar_lea.vmem %s15_s7, 128  ;;  %p56_p1 = scmp.lt.s32.totalorder %s15_s7, %s15_s7 }
   0x4   :  { %p52_p0 = scmp.ne.s32.totalorder %s15_s7, %s51_s8  ;;  %p57_p2 = scmp.lt.s32.totalorder %s51_s8, %s51_s8 }
   0x6   :  { %p58_p3 = por %p57_p2, %p56_p1 }
   0x8   :  { %p59_p4 = pnand %p58_p3, %p52_p0 }
   0xa   :  { %62 = shalt.err (!%p59_p4)
}
   0xb   :  { %17 = dma.hbm_to_vmem [thread:$0]  %s106_s0, 128, %s15_s7, [#allocation3]  }
   0xc   :  { %83 = dma.done.wait [#allocation3], 128  }
   0xd   :  { %84 = vsyncadd [#allocation3], 4294967168  ;;  %v21_v0 = vld [vmem:[#allocation2] sm:$0xff]  ;;  %s88_s11 = smov 1   ;;  %s89_s12 = smov [#allocation5]  }
   0xe   :  { %22 = vrot.lane.b32.xlu0 %v21_v0, %s88_s11  ;;  %s31_s13 = sshll.u32 %s89_s12, 4  ;;  %s32_s13 = int_to_ptr.vmem [resolvable:$true] %s31_s13 }
   0xf   :  { %s63_s14 = scalar_lea.vmem %s32_s13, 128  ;;  %p68_p6 = scmp.lt.s32.totalorder %s32_s13, %s32_s13 }
  0x10   :  { %p64_p5 = scmp.ne.s32.totalorder %s32_s13, %s63_s14  ;;  %p69_p7 = scmp.lt.s32.totalorder %s63_s14, %s63_s14 }
  0x12   :  { %p70_p8 = por %p69_p7, %p68_p6 }
  0x14   :  { %p71_p9 = pnand %p70_p8, %p64_p5 }
  0x80   :  { %v23_v1 = vpop.permute.xlu0 %22 }
  0x81   :  { %24 = vst [vmem:[#allocation5] sm:$0xff] %v23_v1 }
  0x82   :  { %74 = shalt.err (!%p71_p9)
}
  0x83   :  { %34 = dma.vmem_to_hbm [thread:$0]  %s32_s13, 128, %s107_s1, [#allocation4]  }
  0x84   :  { %85 = dma.done.wait [#allocation4], 128  }
  0x85   :  { %86 = vsyncadd [#allocation4], 4294967168 }
  0x86   :  { %38 = vsyncpa [#allocation3], 1 }
  0x87   :  { %39 = vsyncpa [#allocation4], 1 }

</bundles_post_ra>
